<compile_context>
chip_gen: v6e
topology: v6e:2x2x1
jax: 0.10.0
libtpu: 0.0.40
codegen_flags: <defaults>
</compile_context>

<pallas_src>
import jax
import jax.numpy as jnp
from jax.experimental import pallas as pl
from jax.experimental.pallas import tpu as pltpu


def _dumb_model_kernel(x_ref, w_ref, b_ref, o_ref):
    """One batch tile: Linear(F->1) + sigmoid + noisy-OR over the N literals.

    x_ref: (TB, N, F) f32 VMEM  -- TB batch rows, N literals, F features
    w_ref: (1, F)     f32 VMEM  -- linear weight (grid-invariant block)
    b_ref: (1,)       f32 SMEM  -- linear bias (scalar path)
    o_ref: (1, TB)    f32 VMEM  -- lane-dense OR output for this tile
    """
    x = x_ref[...]                                   # (TB, N, F)
    w = w_ref[...]                                   # (1, F) broadcasts over (N, F)
    bias = b_ref[0]                                  # scalar from SMEM

    # Linear (F -> 1) on the VPU: broadcast multiply + lane reduction.
    # (A width-1 matvec on the MXU would waste 127/255 of its columns.)
    s = jnp.sum(x * w, axis=-1) + bias               # (TB, N) logits

    # Noisy OR in log space:  1 - p_n = sigmoid(-s_n)
    #   OR = 1 - prod_n sigmoid(-s_n) = 1 - exp(-sum_n softplus(s_n))
    # Stable softplus; exp/log1p go to the EUP slot.
    softplus_s = jnp.maximum(s, 0.0) + jnp.log1p(jnp.exp(-jnp.abs(s)))  # (TB, N)
    or_vals = 1.0 - jnp.exp(-jnp.sum(softplus_s, axis=-1))              # (TB,)

    o_ref[...] = or_vals[None, :]                    # lane-dense (1, TB) store


def dumb_model_forward(x, weight, bias, *, max_tile_bytes=8 << 20):
    """x: (B, N, F), weight: (1, F), bias: (1,)  ->  (B, 1) float32."""
    B, N, F = x.shape
    x = x.astype(jnp.float32)
    weight = weight.reshape(1, F).astype(jnp.float32)
    bias = bias.reshape(1).astype(jnp.float32)

    # Batch rows per grid step: as many as fit a ~8 MiB tile (the pipeline
    # double-buffers it).  For small problems this collapses to a single step.
    row_bytes = N * F * 4
    tb = max(1, min(B, max_tile_bytes // max(row_bytes, 1)))
    num_tiles = pl.cdiv(B, tb)
    b_pad = num_tiles * tb
    if b_pad != B:
        x = jnp.pad(x, ((0, b_pad - B), (0, 0), (0, 0)))

    # Explicit scoped-VMEM budget: 2 buffers for the x tile + weight/output,
    # capped well below v7x's 64 MiB physical VMEM.
    vmem_limit = int(min(48 << 20, max(32 << 20, 4 * tb * row_bytes + (2 << 20))))

    out = pl.pallas_call(
        _dumb_model_kernel,
        out_shape=jax.ShapeDtypeStruct((num_tiles, tb), jnp.float32),
        grid_spec=pltpu.PrefetchScalarGridSpec(
            num_scalar_prefetch=0,
            grid=(num_tiles,),
            in_specs=[
                pl.BlockSpec((tb, N, F), lambda i: (i, 0, 0)),        # batch tile
                pl.BlockSpec((1, F), lambda i: (0, 0)),               # weight, resident
                pl.BlockSpec(memory_space=pltpu.MemorySpace.SMEM),    # bias scalar
            ],
            out_specs=pl.BlockSpec((1, tb), lambda i: (i, 0)),        # lane-dense
        ),
        compiler_params=pltpu.CompilerParams(
            dimension_semantics=("parallel",),
            vmem_limit_bytes=vmem_limit,
        ),
    )(x, weight, bias)

    # (num_tiles, TB) row-major == batch order; drop padding, return (B, 1).
    return out.reshape(-1)[:B].reshape(B, 1)


def _reference_forward(x, weight, bias):
    s = jnp.einsum("bnf,of->bno", x, weight) + bias   # (B, N, 1)
    p = jax.nn.sigmoid(s)
    return 1.0 - jnp.prod(1.0 - p, axis=1)            # (B, 1)


if __name__ == "__main__":
    B, N, F = 2, 8, 32  # batch, literals, in_features

    key = jax.random.PRNGKey(0)
    kx, kw, kb = jax.random.split(key, 3)

    # Deterministic parameter init (nn.Linear-style uniform bound 1/sqrt(F)).
    bound = 1.0 / (F ** 0.5)
    weight = jax.random.uniform(kw, (1, F), jnp.float32, -bound, bound)
    bias = jax.random.uniform(kb, (1,), jnp.float32, -bound, bound)

    x = jax.random.normal(kx, (B, N, F), jnp.float32)

    out = dumb_model_forward(x, weight, bias)
    out = jax.block_until_ready(out)

    ref = _reference_forward(x, weight, bias)
    assert out.shape == (B, 1)
    assert jnp.allclose(out, ref, atol=1e-5, rtol=1e-5), (out, ref)

    print("KERNEL_OK")
</pallas_src>

<mosaic_0001>
module attributes {stable_mosaic.version = 11 : i64} {
  func.func @_dumb_model_kernel(%arg0: i32, %arg1: memref<2x8x32xf32, #tpu.memory_space<vmem>>, %arg2: memref<1x32xf32, #tpu.memory_space<vmem>>, %arg3: memref<1xf32, #tpu.memory_space<smem>>, %arg4: memref<1x2xf32, #tpu.memory_space<vmem>>) attributes {dimension_semantics = [#tpu.dimension_semantics<parallel>], iteration_bounds = array<i64: 1>, scalar_prefetch = 0 : i64, scratch_operands = 0 : i64, tpu.core_type = #tpu.core_type<tc>, window_params = [{transform_indices = @transform_0, window_bounds = array<i64: 2, 8, 32>}, {pipeline_mode = #tpu.pipeline_mode<synchronous>, transform_indices = @transform_1, window_bounds = array<i64: 1, 32>}, {transform_indices = @transform_2, window_bounds = array<i64: 1>}, {transform_indices = @transform_3, window_bounds = array<i64: 1, 2>}]} {
    %c0 = arith.constant 0 : index
    %c0_0 = arith.constant 0 : index
    %c0_1 = arith.constant 0 : index
    %0 = vector.load %arg1[%c0, %c0_0, %c0_1] : memref<2x8x32xf32, #tpu.memory_space<vmem>>, vector<2x8x32xf32>
    %c0_2 = arith.constant 0 : index
    %c0_3 = arith.constant 0 : index
    %1 = vector.load %arg2[%c0_2, %c0_3] : memref<1x32xf32, #tpu.memory_space<vmem>>, vector<1x32xf32>
    %c0_4 = arith.constant 0 : index
    %2 = memref.load %arg3[%c0_4] : memref<1xf32, #tpu.memory_space<smem>>
    %3 = vector.shape_cast %1 : vector<1x32xf32> to vector<1x1x32xf32>
    %4 = vector.broadcast %3 : vector<1x1x32xf32> to vector<2x8x32xf32>
    %5 = arith.mulf %0, %4 : vector<2x8x32xf32>
    %cst = arith.constant dense<0.000000e+00> : vector<2x8xf32>
    %6 = vector.multi_reduction <add>, %5, %cst [2] : vector<2x8x32xf32> to vector<2x8xf32>
    %7 = vector.broadcast %2 : f32 to vector<2x8xf32>
    %8 = arith.addf %6, %7 : vector<2x8xf32>
    %cst_5 = arith.constant 0.000000e+00 : f32
    %9 = vector.broadcast %cst_5 : f32 to vector<2x8xf32>
    %10 = arith.maximumf %8, %9 : vector<2x8xf32>
    %11 = math.absf %8 : vector<2x8xf32>
    %cst_6 = arith.constant 0.000000e+00 : f32
    %12 = vector.broadcast %cst_6 : f32 to vector<2x8xf32>
    %13 = arith.subf %12, %11 : vector<2x8xf32>
    %14 = math.exp %13 : vector<2x8xf32>
    %15 = math.log1p %14 : vector<2x8xf32>
    %16 = arith.addf %10, %15 : vector<2x8xf32>
    %cst_7 = arith.constant dense<0.000000e+00> : vector<2xf32>
    %17 = vector.multi_reduction <add>, %16, %cst_7 [1] : vector<2x8xf32> to vector<2xf32>
    %cst_8 = arith.constant 0.000000e+00 : f32
    %18 = vector.broadcast %cst_8 : f32 to vector<2xf32>
    %19 = arith.subf %18, %17 : vector<2xf32>
    %20 = math.exp %19 : vector<2xf32>
    %cst_9 = arith.constant 1.000000e+00 : f32
    %21 = vector.broadcast %cst_9 : f32 to vector<2xf32>
    %22 = arith.subf %21, %20 : vector<2xf32>
    %23 = vector.shape_cast %22 : vector<2xf32> to vector<1x2xf32>
    %c0_10 = arith.constant 0 : index
    %c0_11 = arith.constant 0 : index
    %24 = vector.load %arg4[%c0_10, %c0_11] : memref<1x2xf32, #tpu.memory_space<vmem>>, vector<1x2xf32>
    tpu.vector_store %arg4[%c0_10, %c0_11], %23 {strides = array<i32>} : memref<1x2xf32, #tpu.memory_space<vmem>>, vector<1x2xf32>,
    return
  }
  func.func @transform_0(%arg0: i32) -> (i32, i32, i32) {
    %c0_i32 = arith.constant 0 : i32
    %c0_i32_0 = arith.constant 0 : i32
    %c0_i32_1 = arith.constant 0 : i32
    return %arg0, %c0_i32, %c0_i32_0 : i32, i32, i32
  }
  func.func @transform_1(%arg0: i32) -> (i32, i32) {
    %c0_i32 = arith.constant 0 : i32
    %c0_i32_0 = arith.constant 0 : i32
    %c0_i32_1 = arith.constant 0 : i32
    return %c0_i32, %c0_i32_0 : i32, i32
  }
  func.func @transform_2(%arg0: i32) -> i32 {
    %c0_i32 = arith.constant 0 : i32
    %c0_i32_0 = arith.constant 0 : i32
    return %c0_i32 : i32
  }
  func.func @transform_3(%arg0: i32) -> (i32, i32) {
    %c0_i32 = arith.constant 0 : i32
    %c0_i32_0 = arith.constant 0 : i32
    return %arg0, %c0_i32 : i32, i32
  }
}

</mosaic_0001>

<bundles_post_ra>
// kernel: tpu_custom_call.1
= control target key start
LH: loop header
LB: loop body
LE: loop exit
PB: predicated region body
PF: predicated region fallthrough
CT: control target
= control target key end

     0   :  { %9 = vsyncpa [#allocation4], 0  ;;  %s223_s0 = inlined_call_operand.hbm [shape: f32[2,8,32], index: 0, kind: input, shape index: {}]   ;;  %s224_s1 = inlined_call_operand.vmem [shape: f32[1,32], index: 1, kind: input, shape index: {}]   ;;  %s225_s2 = inlined_call_operand.<no memory space> [shape: f32[1], index: 2, kind: input, shape index: {}]   ;;  %s226_s3 = inlined_call_operand.hbm [shape: f32[1,2], index: 3, kind: output, shape index: {}]  }
   0x1   :  { %10 = vsyncpa [#allocation5], 0  ;;  %s187_s12 = smov [#allocation3]  }
   0x2   :  { %s16_s13 = sshll.u32 %s187_s12, 4  ;;  %s17_s13 = int_to_ptr.vmem [resolvable:$true] %s16_s13 }
   0x3   :  { %s151_s14 = scalar_lea.vmem %s17_s13, 256  ;;  %p156_p1 = scmp.lt.s32.totalorder %s17_s13, %s17_s13 }
   0x4   :  { %p152_p0 = scmp.ne.s32.totalorder %s17_s13, %s151_s14  ;;  %p157_p2 = scmp.lt.s32.totalorder %s151_s14, %s151_s14 }
   0x6   :  { %p158_p3 = por %p157_p2, %p156_p1 }
   0x8   :  { %p159_p4 = pnand %p158_p3, %p152_p0 }
   0xa   :  { %162 = shalt.err (!%p159_p4)
}
   0xb   :  { %s188_s15 = smov 128   ;;  %s189_s16 = smov 8  }
   0xc   :  { %22 = dma.hbm_to_vmem [thread:$0]  %s223_s0, 256, %s17_s13, [#allocation4], %s188_s15, %s188_s15, %s189_s16  }
   0xd   :  { %183 = dma.done.wait [#allocation4], 256  }
   0xe   :  { %184 = vsyncadd [#allocation4], 4294967040  ;;  %v30_v0 = vld [vmem:[#allocation3] sm:$0xff]  ;;  %vm42_vm0 = vcmask 261120   ;;  %v31_v2 = vld [vmem:[#allocation3 + $0x8] sm:$0xff]  ;;  %v49_v7 = vstv %s225_s2  ;;  %v84_v26 = vlaneseq  ;;  %vm94_vm3 = vcmask 1041409  }
   0xf   :  { %v128_v1 = vld [vmem:[%s224_s1] ss:$0 sm:$0xff]  ;;  %vm97_vm4 = vcmask 58368   ;;  %s190_s0 = smov [#allocation6]   ;;  %vm111_vm5 = vcmask 8192  }
  0x10   :  { %v40_v3 = vmul.f32 %v128_v1, %v30_v0  ;;  %v41_v4 = vmul.f32 %v128_v1, %v31_v2  ;;  %v85_v32 = vand.u32 127, %v84_v26  ;;  %v87_v33 = vshrl.u32 %v84_v26, 7  ;;  %s119_s1 = sshll.u32 %s190_s0, 4  ;;  %s120_s1 = int_to_ptr.vmem [resolvable:$true] %s119_s1 }
  0x11   :  { %s163_s2 = scalar_lea.vmem %s120_s1, 16  ;;  %s167_s23 = scalar_lea.vmem %s120_s1, 32 }
  0x12   :  { %v43_v5 = vsel %vm42_vm0, %v40_v3, 0.0  ;;  %v46_v6 = vsel %vm42_vm0, %v41_v4, 0.0  ;;  %v88_v41 = vsub.s32 %v85_v32, %v87_v33  ;;  %p164_p5 = scmp.ne.s32.totalorder %s120_s1, %s163_s2  ;;  %p168_p6 = scmp.lt.s32.totalorder %s120_s1, %s120_s1 }
  0x13   :  { %44 = vadd.xlane.f32.xlu0 %v43_v5  ;;  %p169_p7 = scmp.lt.s32.totalorder %s167_s23, %s163_s2 }
  0x15   :  { %p170_p8 = por %p169_p7, %p168_p6 }
  0x17   :  { %47 = vadd.xlane.f32.xlu0 %v46_v6  ;;  %p171_p9 = pnand %p170_p8, %p164_p5 }
  0x9c   :  { %v45_v8 = vpop.xlane.xlu0 %44 }
  0x9d   :  { %v50_v9 = vadd.f32 %v49_v7, %v45_v8 }
  0x9f   :  { %v54_v10 = vand.u32 2147483647, %v50_v9  ;;  %v52_v36 = vmax.f32 %v50_v9, 0.0 }
  0xa0   :  { %v48_v11 = vpop.xlane.xlu0 %47 }
  0xa1   :  { %v56_v12 = vsub.f32 0.0, %v54_v10  ;;  %v51_v13 = vadd.f32 %v49_v7, %v48_v11 }
  0xa3   :  { %v58_v14 = vmul.f32 1.442695, %v56_v12  ;;  %v55_v15 = vand.u32 2147483647, %v51_v13  ;;  %v53_v40 = vmax.f32 %v51_v13, 0.0 }
  0xa5   :  { %133 = vpow2.f32 %v58_v14  ;;  %v57_v16 = vsub.f32 0.0, %v55_v15 }
  0xa7   :  { %v60_v17 = vmul.f32 1.442695, %v57_v16 }
  0xa9   :  { %135 = vpow2.f32 %v60_v17 }
  0xb2   :  { %v134_v18 = vpop.eup %133 }
  0xb3   :  { %v62_v19 = vadd.f32 1.0, %v134_v18  ;;  %v65_v22 = vmul.f32 -0.5, %v134_v18  ;;  %v68_v25 = vand.u32 2147483647, %v134_v18 }
  0xb5   :  { %137 = vlog2.f32 %v62_v19  ;;  %v66_v23 = vadd.f32 1.0, %v65_v22  ;;  %vm69_vm1 = vcmp.lt.f32.partialorder %v68_v25, 0.0004427343 }
  0xb6   :  { %v136_v20 = vpop.eup %135 }
  0xb7   :  { %v71_v21 = vadd.f32 1.0, %v136_v20  ;;  %v74_v24 = vmul.f32 -0.5, %v136_v20  ;;  %v67_v29 = vmul.f32 %v134_v18, %v66_v23  ;;  %v77_v31 = vand.u32 2147483647, %v136_v20 }
  0xb9   :  { %139 = vlog2.f32 %v71_v21  ;;  %v75_v30 = vadd.f32 1.0, %v74_v24  ;;  %vm78_vm2 = vcmp.lt.f32.partialorder %v77_v31, 0.0004427343 }
  0xbb   :  { %v76_v38 = vmul.f32 %v136_v20, %v75_v30 }
  0xc2   :  { %v138_v27 = vpop.eup %137 }
  0xc3   :  { %v64_v28 = vmul.f32 0.6931472, %v138_v27 }
  0xc5   :  { %v70_v34 = vsel %vm69_vm1, %v67_v29, %v64_v28 }
  0xc6   :  { %v140_v35 = vpop.eup %139  ;;  %v80_v39 = vadd.f32 %v70_v34, %v52_v36 }
  0xc7   :  { %v73_v37 = vmul.f32 0.6931472, %v140_v35 }
  0xc8   :  { %v89_v44 = vrot.slane %v80_v39, %v88_v41 }
  0xc9   :  { %v79_v42 = vsel %vm78_vm2, %v76_v38, %v73_v37 }
  0xca   :  { %v81_v43 = vadd.f32 %v79_v42, %v53_v40 }
  0xcc   :  { %v93_v45 = vrot.slane %v81_v43, %v88_v41 }
  0xce   :  { %v95_v46 = vsel %vm94_vm3, %v93_v45, %v89_v44 }
  0xcf   :  { %v98_v47 = vsel %vm97_vm4, %v95_v46, 0.0 }
  0xd0   :  { %99 = vadd.xlane.f32.xlu1 %v98_v47 }
 0x159   :  { %v100_v48 = vpop.xlane.xlu1 %99 }
 0x15a   :  { %v101_v49 = vsub.f32 0.0, %v100_v48 }
 0x15c   :  { %v102_v50 = vmul.f32 1.442695, %v101_v49 }
 0x15e   :  { %141 = vpow2.f32 %v102_v50 }
 0x16b   :  { %v142_v51 = vpop.eup %141 }
 0x16c   :  { %v104_v52 = vsub.f32 1.0, %v142_v51 }
 0x16e   :  { %v109_v53 = vrot.slane %v104_v52, %v88_v41 }
 0x170   :  { %112 = vst.msk [vmem:[#allocation6] sm:$0x1] %vm111_vm5, %v109_v53 }
 0x171   :  { %174 = shalt.err (!%p171_p9)
}
 0x172   :  { %122 = dma.vmem_to_hbm [thread:$0]  %s120_s1, 16, %s226_s3, [#allocation5]  }
 0x173   :  { %185 = dma.done.wait [#allocation5], 16  }
 0x174   :  { %186 = vsyncadd [#allocation5], 4294967280 }
 0x175   :  { %126 = vsyncpa [#allocation4], 1 }
 0x176   :  { %127 = vsyncpa [#allocation5], 1 }

</bundles_post_ra>
